<compile_context>
chip_gen: v6e
topology: v6e:2x2x1
jax: 0.10.0
libtpu: 0.0.40
codegen_flags: <defaults>
</compile_context>

<pallas_src>
import jax
import jax.numpy as jnp
from jax import lax
from jax.experimental import pallas as pl
from jax.experimental.pallas import tpu as pltpu
import numpy as np


def _make_gru_kernel(T, B, H):
    """Build a GRU+FC kernel for static sequence length T, batch B, hidden H."""

    def _gru_kernel(x_ref, h0_ref, wih_ref, whh_ref, bgi_ref, bhhn_ref,
                    wfc_ref, bfc_ref, y_ref, hn_ref):
        # ---- (1) hoisted input projection: one batched MXU matmul over all timesteps,
        #          off the serial recurrence chain. b_ih (+ b_hh for r/z) prefolded in b_gi.
        gi = jnp.dot(x_ref[...], wih_ref[...],
                     preferred_element_type=jnp.float32) + bgi_ref[...]

        # Pre-split loop-invariant per-gate / per-timestep slices ONCE, before the loop
        # (t*B is not sublane-aligned for small B; keep these extracts off the h-chain).
        gi_r = [gi[t * B:(t + 1) * B, 0 * H:1 * H] for t in range(T)]
        gi_z = [gi[t * B:(t + 1) * B, 1 * H:2 * H] for t in range(T)]
        gi_n = [gi[t * B:(t + 1) * B, 2 * H:3 * H] for t in range(T)]

        whh = whh_ref[...]                                     # (H, 3H), loaded once
        b_hh_n = jnp.broadcast_to(bhhn_ref[...], (B, H))       # hoisted broadcast

        # ---- (2) serial recurrence: T is small & static -> fully unrolled straight-line
        #          code. ONE fused (B,H)@(H,3H) hidden matmul per step on the chain.
        # TODO(synk): for large T switch to lax.fori_loop(..., unroll=4..8) with a VMEM
        # staging buffer to bound vreg live ranges / compile time; and for large T*B/H
        # add a time-chunk "arbitrary" grid axis + vmem_limit_bytes (v7x has 64 MiB VMEM).
        h = h0_ref[...]
        hs = []
        for t in range(T):
            gh = jnp.dot(h, whh, preferred_element_type=jnp.float32)   # (B, 3H)
            r = jax.nn.sigmoid(gi_r[t] + gh[:, 0 * H:1 * H])
            z = jax.nn.sigmoid(gi_z[t] + gh[:, 1 * H:2 * H])
            n = jnp.tanh(gi_n[t] + r * (gh[:, 2 * H:3 * H] + b_hh_n))
            h = (1.0 - z) * n + z * h
            hs.append(h)                   # keep h_t in vregs; no sub-tile VMEM stores

        hn_ref[...] = h

        # ---- (3) batched per-timestep FC: one (T*B, H) @ (H, O) matmul + one dense store.
        h_all = jnp.concatenate(hs, axis=0)                    # (T*B, H), still in vregs
        y_ref[...] = (jnp.dot(h_all, wfc_ref[...],
                              preferred_element_type=jnp.float32) + bfc_ref[...])

    return _gru_kernel


def gru_model_forward(x_btI, h_state, params):
    """x_btI: (B, T, I) batch_first; h_state: (1, B, H). Returns ((B, T, O), (1, B, H))."""
    wih, whh, bih, bhh, wfc, bfc = params
    B, T, I = x_btI.shape
    H = whh.shape[0]
    O = wfc.shape[1]

    # time-major, flattened so the hoisted input projection is one batched matmul
    x_tb = jnp.transpose(x_btI, (1, 0, 2)).reshape(T * B, I).astype(jnp.float32)
    h0 = h_state[0].astype(jnp.float32)                        # (B, H)

    # prefold biases: r/z see b_ih + b_hh summed inside the sigmoid; b_ih_n folds into
    # the hoisted input projection; b_hh_n stays separate (multiplied by r).
    b_gi = jnp.concatenate([bih[:2 * H] + bhh[:2 * H], bih[2 * H:]]).reshape(1, 3 * H)
    b_hh_n = bhh[2 * H:].reshape(1, H)
    bfc2 = bfc.reshape(1, O)

    vmem = pl.BlockSpec(memory_space=pltpu.MemorySpace.VMEM)

    y_flat, hn = pl.pallas_call(
        _make_gru_kernel(T, B, H),
        out_shape=(
            jax.ShapeDtypeStruct((T * B, O), jnp.float32),
            jax.ShapeDtypeStruct((B, H), jnp.float32),
        ),
        in_specs=[vmem] * 8,
        out_specs=(vmem, vmem),
    )(x_tb, h0, wih, whh, b_gi, b_hh_n, wfc, bfc2)

    # TODO(synk): on v7x, add a leading "parallel" batch grid axis only when the
    # per-TensorCore batch is >= 8 (one sublane block); at B=2 it would just duplicate
    # the serial chain. Likewise keep y lane-sparse here (O=1, 64 B write); emit it
    # lane-dense (last dim multiple of 128 or transposed) only if O / T*B grow.

    outputs = jnp.transpose(y_flat.reshape(T, B, O), (1, 0, 2))   # (B, T, O)
    h_state_n = hn[None, :, :]                                    # (1, B, H)
    return outputs, h_state_n


def _ref_forward(x_btI, h_state, params):
    """Pure-JAX reference (unfused, PyTorch-style) for numerical verification."""
    wih, whh, bih, bhh, wfc, bfc = params
    H = whh.shape[0]
    x_tbi = jnp.transpose(x_btI, (1, 0, 2))
    h0 = h_state[0]

    def step(h, x_t):
        gi = x_t @ wih + bih
        gh = h @ whh + bhh
        r = jax.nn.sigmoid(gi[:, :H] + gh[:, :H])
        z = jax.nn.sigmoid(gi[:, H:2 * H] + gh[:, H:2 * H])
        n = jnp.tanh(gi[:, 2 * H:] + r * gh[:, 2 * H:])
        h_new = (1.0 - z) * n + z * h
        y = h_new @ wfc + bfc
        return h_new, y

    hT, ys = lax.scan(step, h0, x_tbi)
    return jnp.transpose(ys, (1, 0, 2)), hT[None, :, :]


def init_params(key, input_dim, hidden_size, output_dim):
    """Deterministic init mimicking PyTorch uniform(-1/sqrt(H), 1/sqrt(H))."""
    k = 1.0 / np.sqrt(hidden_size)
    keys = jax.random.split(key, 6)
    wih = jax.random.uniform(keys[0], (input_dim, 3 * hidden_size), jnp.float32, -k, k)
    whh = jax.random.uniform(keys[1], (hidden_size, 3 * hidden_size), jnp.float32, -k, k)
    bih = jax.random.uniform(keys[2], (3 * hidden_size,), jnp.float32, -k, k)
    bhh = jax.random.uniform(keys[3], (3 * hidden_size,), jnp.float32, -k, k)
    wfc = jax.random.uniform(keys[4], (hidden_size, output_dim), jnp.float32, -k, k)
    bfc = jax.random.uniform(keys[5], (output_dim,), jnp.float32, -k, k)
    return (wih, whh, bih, bhh, wfc, bfc)


if __name__ == "__main__":
    # small shapes consistent with the module: input_dim=1, hidden=32, output_dim=1
    B, T, I, H, O = 2, 8, 1, 32, 1

    key = jax.random.PRNGKey(0)
    k_x, k_p = jax.random.split(key)
    x = jax.random.normal(k_x, (B, T, I), jnp.float32)          # batch_first input
    h_state = jnp.zeros((1, B, H), jnp.float32)                 # initHidden()
    params = init_params(k_p, I, H, O)

    outputs, h_n = jax.jit(gru_model_forward)(x, h_state, params)
    outputs = jax.block_until_ready(outputs)
    h_n = jax.block_until_ready(h_n)

    ref_out, ref_hn = _ref_forward(x, h_state, params)
    assert outputs.shape == (B, T, O) and h_n.shape == (1, B, H)
    np.testing.assert_allclose(np.asarray(outputs), np.asarray(ref_out), rtol=1e-5, atol=1e-5)
    np.testing.assert_allclose(np.asarray(h_n), np.asarray(ref_hn), rtol=1e-5, atol=1e-5)

    print("KERNEL_OK")
</pallas_src>

<mosaic_0001>
module attributes {stable_mosaic.version = 11 : i64} {
  func.func @_gru_kernel(%arg0: memref<16x1xf32, #tpu.memory_space<vmem>>, %arg1: memref<2x32xf32, #tpu.memory_space<vmem>>, %arg2: memref<1x96xf32, #tpu.memory_space<vmem>>, %arg3: memref<32x96xf32, #tpu.memory_space<vmem>>, %arg4: memref<1x96xf32, #tpu.memory_space<vmem>>, %arg5: memref<1x32xf32, #tpu.memory_space<vmem>>, %arg6: memref<32x1xf32, #tpu.memory_space<vmem>>, %arg7: memref<1x1xf32, #tpu.memory_space<vmem>>, %arg8: memref<16x1xf32, #tpu.memory_space<vmem>>, %arg9: memref<2x32xf32, #tpu.memory_space<vmem>>) attributes {dimension_semantics = [], scalar_prefetch = 0 : i64, scratch_operands = 0 : i64, tpu.core_type = #tpu.core_type<tc>} {
    %c0 = arith.constant 0 : index
    %c0_0 = arith.constant 0 : index
    %0 = vector.load %arg0[%c0, %c0_0] : memref<16x1xf32, #tpu.memory_space<vmem>>, vector<16x1xf32>
    %c0_1 = arith.constant 0 : index
    %c0_2 = arith.constant 0 : index
    %1 = vector.load %arg2[%c0_1, %c0_2] : memref<1x96xf32, #tpu.memory_space<vmem>>, vector<1x96xf32>
    %cst = arith.constant dense<0.000000e+00> : vector<16x96xf32>
    %2 = tpu.matmul %0, %1, %cst {dimension_numbers = #tpu.dot_dimension_numbers<[1], [0], [0], [1], [0, 0, 1, 1], [], []>} : vector<16x1xf32>, vector<1x96xf32>, vector<16x96xf32> -> vector<16x96xf32>
    %c0_3 = arith.constant 0 : index
    %c0_4 = arith.constant 0 : index
    %3 = vector.load %arg4[%c0_3, %c0_4] : memref<1x96xf32, #tpu.memory_space<vmem>>, vector<1x96xf32>
    %4 = vector.broadcast %3 : vector<1x96xf32> to vector<16x96xf32>
    %5 = arith.addf %2, %4 : vector<16x96xf32>
    %6 = vector.extract_strided_slice %5 {offsets = [0, 0], sizes = [2, 32], strides = [1, 1]} : vector<16x96xf32> to vector<2x32xf32>
    %7 = vector.extract_strided_slice %5 {offsets = [2, 0], sizes = [2, 32], strides = [1, 1]} : vector<16x96xf32> to vector<2x32xf32>
    %8 = vector.extract_strided_slice %5 {offsets = [4, 0], sizes = [2, 32], strides = [1, 1]} : vector<16x96xf32> to vector<2x32xf32>
    %9 = vector.extract_strided_slice %5 {offsets = [6, 0], sizes = [2, 32], strides = [1, 1]} : vector<16x96xf32> to vector<2x32xf32>
    %10 = vector.extract_strided_slice %5 {offsets = [8, 0], sizes = [2, 32], strides = [1, 1]} : vector<16x96xf32> to vector<2x32xf32>
    %11 = vector.extract_strided_slice %5 {offsets = [10, 0], sizes = [2, 32], strides = [1, 1]} : vector<16x96xf32> to vector<2x32xf32>
    %12 = vector.extract_strided_slice %5 {offsets = [12, 0], sizes = [2, 32], strides = [1, 1]} : vector<16x96xf32> to vector<2x32xf32>
    %13 = vector.extract_strided_slice %5 {offsets = [14, 0], sizes = [2, 32], strides = [1, 1]} : vector<16x96xf32> to vector<2x32xf32>
    %14 = vector.extract_strided_slice %5 {offsets = [0, 32], sizes = [2, 32], strides = [1, 1]} : vector<16x96xf32> to vector<2x32xf32>
    %15 = vector.extract_strided_slice %5 {offsets = [2, 32], sizes = [2, 32], strides = [1, 1]} : vector<16x96xf32> to vector<2x32xf32>
    %16 = vector.extract_strided_slice %5 {offsets = [4, 32], sizes = [2, 32], strides = [1, 1]} : vector<16x96xf32> to vector<2x32xf32>
    %17 = vector.extract_strided_slice %5 {offsets = [6, 32], sizes = [2, 32], strides = [1, 1]} : vector<16x96xf32> to vector<2x32xf32>
    %18 = vector.extract_strided_slice %5 {offsets = [8, 32], sizes = [2, 32], strides = [1, 1]} : vector<16x96xf32> to vector<2x32xf32>
    %19 = vector.extract_strided_slice %5 {offsets = [10, 32], sizes = [2, 32], strides = [1, 1]} : vector<16x96xf32> to vector<2x32xf32>
    %20 = vector.extract_strided_slice %5 {offsets = [12, 32], sizes = [2, 32], strides = [1, 1]} : vector<16x96xf32> to vector<2x32xf32>
    %21 = vector.extract_strided_slice %5 {offsets = [14, 32], sizes = [2, 32], strides = [1, 1]} : vector<16x96xf32> to vector<2x32xf32>
    %22 = vector.extract_strided_slice %5 {offsets = [0, 64], sizes = [2, 32], strides = [1, 1]} : vector<16x96xf32> to vector<2x32xf32>
    %23 = vector.extract_strided_slice %5 {offsets = [2, 64], sizes = [2, 32], strides = [1, 1]} : vector<16x96xf32> to vector<2x32xf32>
    %24 = vector.extract_strided_slice %5 {offsets = [4, 64], sizes = [2, 32], strides = [1, 1]} : vector<16x96xf32> to vector<2x32xf32>
    %25 = vector.extract_strided_slice %5 {offsets = [6, 64], sizes = [2, 32], strides = [1, 1]} : vector<16x96xf32> to vector<2x32xf32>
    %26 = vector.extract_strided_slice %5 {offsets = [8, 64], sizes = [2, 32], strides = [1, 1]} : vector<16x96xf32> to vector<2x32xf32>
    %27 = vector.extract_strided_slice %5 {offsets = [10, 64], sizes = [2, 32], strides = [1, 1]} : vector<16x96xf32> to vector<2x32xf32>
    %28 = vector.extract_strided_slice %5 {offsets = [12, 64], sizes = [2, 32], strides = [1, 1]} : vector<16x96xf32> to vector<2x32xf32>
    %29 = vector.extract_strided_slice %5 {offsets = [14, 64], sizes = [2, 32], strides = [1, 1]} : vector<16x96xf32> to vector<2x32xf32>
    %c0_5 = arith.constant 0 : index
    %c0_6 = arith.constant 0 : index
    %30 = vector.load %arg3[%c0_5, %c0_6] : memref<32x96xf32, #tpu.memory_space<vmem>>, vector<32x96xf32>
    %c0_7 = arith.constant 0 : index
    %c0_8 = arith.constant 0 : index
    %31 = vector.load %arg5[%c0_7, %c0_8] : memref<1x32xf32, #tpu.memory_space<vmem>>, vector<1x32xf32>
    %32 = vector.shape_cast %31 : vector<1x32xf32> to vector<1x32xf32>
    %33 = vector.broadcast %32 : vector<1x32xf32> to vector<2x32xf32>
    %c0_9 = arith.constant 0 : index
    %c0_10 = arith.constant 0 : index
    %34 = vector.load %arg1[%c0_9, %c0_10] : memref<2x32xf32, #tpu.memory_space<vmem>>, vector<2x32xf32>
    %cst_11 = arith.constant dense<0.000000e+00> : vector<2x96xf32>
    %35 = tpu.matmul %34, %30, %cst_11 {dimension_numbers = #tpu.dot_dimension_numbers<[1], [0], [0], [1], [0, 0, 1, 1], [], []>} : vector<2x32xf32>, vector<32x96xf32>, vector<2x96xf32> -> vector<2x96xf32>
    %36 = vector.extract_strided_slice %35 {offsets = [0, 0], sizes = [2, 32], strides = [1, 1]} : vector<2x96xf32> to vector<2x32xf32>
    %37 = arith.addf %6, %36 : vector<2x32xf32>
    %38 = arith.negf %37 : vector<2x32xf32>
    %39 = math.exp %38 : vector<2x32xf32>
    %cst_12 = arith.constant 1.000000e+00 : f32
    %40 = vector.broadcast %cst_12 : f32 to vector<2x32xf32>
    %41 = arith.addf %40, %39 : vector<2x32xf32>
    %42 = arith.divf %40, %41 : vector<2x32xf32>
    %43 = vector.extract_strided_slice %35 {offsets = [0, 32], sizes = [2, 32], strides = [1, 1]} : vector<2x96xf32> to vector<2x32xf32>
    %44 = arith.addf %14, %43 : vector<2x32xf32>
    %45 = arith.negf %44 : vector<2x32xf32>
    %46 = math.exp %45 : vector<2x32xf32>
    %cst_13 = arith.constant 1.000000e+00 : f32
    %47 = vector.broadcast %cst_13 : f32 to vector<2x32xf32>
    %48 = arith.addf %47, %46 : vector<2x32xf32>
    %49 = arith.divf %47, %48 : vector<2x32xf32>
    %50 = vector.extract_strided_slice %35 {offsets = [0, 64], sizes = [2, 32], strides = [1, 1]} : vector<2x96xf32> to vector<2x32xf32>
    %51 = arith.addf %50, %33 : vector<2x32xf32>
    %52 = arith.mulf %42, %51 : vector<2x32xf32>
    %53 = arith.addf %22, %52 : vector<2x32xf32>
    %54 = math.tanh %53 : vector<2x32xf32>
    %cst_14 = arith.constant 1.000000e+00 : f32
    %55 = vector.broadcast %cst_14 : f32 to vector<2x32xf32>
    %56 = arith.subf %55, %49 : vector<2x32xf32>
    %57 = arith.mulf %56, %54 : vector<2x32xf32>
    %58 = arith.mulf %49, %34 : vector<2x32xf32>
    %59 = arith.addf %57, %58 : vector<2x32xf32>
    %cst_15 = arith.constant dense<0.000000e+00> : vector<2x96xf32>
    %60 = tpu.matmul %59, %30, %cst_15 {dimension_numbers = #tpu.dot_dimension_numbers<[1], [0], [0], [1], [0, 0, 1, 1], [], []>} : vector<2x32xf32>, vector<32x96xf32>, vector<2x96xf32> -> vector<2x96xf32>
    %61 = vector.extract_strided_slice %60 {offsets = [0, 0], sizes = [2, 32], strides = [1, 1]} : vector<2x96xf32> to vector<2x32xf32>
    %62 = arith.addf %7, %61 : vector<2x32xf32>
    %63 = arith.negf %62 : vector<2x32xf32>
    %64 = math.exp %63 : vector<2x32xf32>
    %cst_16 = arith.constant 1.000000e+00 : f32
    %65 = vector.broadcast %cst_16 : f32 to vector<2x32xf32>
    %66 = arith.addf %65, %64 : vector<2x32xf32>
    %67 = arith.divf %65, %66 : vector<2x32xf32>
    %68 = vector.extract_strided_slice %60 {offsets = [0, 32], sizes = [2, 32], strides = [1, 1]} : vector<2x96xf32> to vector<2x32xf32>
    %69 = arith.addf %15, %68 : vector<2x32xf32>
    %70 = arith.negf %69 : vector<2x32xf32>
    %71 = math.exp %70 : vector<2x32xf32>
    %cst_17 = arith.constant 1.000000e+00 : f32
    %72 = vector.broadcast %cst_17 : f32 to vector<2x32xf32>
    %73 = arith.addf %72, %71 : vector<2x32xf32>
    %74 = arith.divf %72, %73 : vector<2x32xf32>
    %75 = vector.extract_strided_slice %60 {offsets = [0, 64], sizes = [2, 32], strides = [1, 1]} : vector<2x96xf32> to vector<2x32xf32>
    %76 = arith.addf %75, %33 : vector<2x32xf32>
    %77 = arith.mulf %67, %76 : vector<2x32xf32>
    %78 = arith.addf %23, %77 : vector<2x32xf32>
    %79 = math.tanh %78 : vector<2x32xf32>
    %cst_18 = arith.constant 1.000000e+00 : f32
    %80 = vector.broadcast %cst_18 : f32 to vector<2x32xf32>
    %81 = arith.subf %80, %74 : vector<2x32xf32>
    %82 = arith.mulf %81, %79 : vector<2x32xf32>
    %83 = arith.mulf %74, %59 : vector<2x32xf32>
    %84 = arith.addf %82, %83 : vector<2x32xf32>
    %cst_19 = arith.constant dense<0.000000e+00> : vector<2x96xf32>
    %85 = tpu.matmul %84, %30, %cst_19 {dimension_numbers = #tpu.dot_dimension_numbers<[1], [0], [0], [1], [0, 0, 1, 1], [], []>} : vector<2x32xf32>, vector<32x96xf32>, vector<2x96xf32> -> vector<2x96xf32>
    %86 = vector.extract_strided_slice %85 {offsets = [0, 0], sizes = [2, 32], strides = [1, 1]} : vector<2x96xf32> to vector<2x32xf32>
    %87 = arith.addf %8, %86 : vector<2x32xf32>
    %88 = arith.negf %87 : vector<2x32xf32>
    %89 = math.exp %88 : vector<2x32xf32>
    %cst_20 = arith.constant 1.000000e+00 : f32
    %90 = vector.broadcast %cst_20 : f32 to vector<2x32xf32>
    %91 = arith.addf %90, %89 : vector<2x32xf32>
    %92 = arith.divf %90, %91 : vector<2x32xf32>
    %93 = vector.extract_strided_slice %85 {offsets = [0, 32], sizes = [2, 32], strides = [1, 1]} : vector<2x96xf32> to vector<2x32xf32>
    %94 = arith.addf %16, %93 : vector<2x32xf32>
    %95 = arith.negf %94 : vector<2x32xf32>
    %96 = math.exp %95 : vector<2x32xf32>
    %cst_21 = arith.constant 1.000000e+00 : f32
    %97 = vector.broadcast %cst_21 : f32 to vector<2x32xf32>
    %98 = arith.addf %97, %96 : vector<2x32xf32>
    %99 = arith.divf %97, %98 : vector<2x32xf32>
    %100 = vector.extract_strided_slice %85 {offsets = [0, 64], sizes = [2, 32], strides = [1, 1]} : vector<2x96xf32> to vector<2x32xf32>
    %101 = arith.addf %100, %33 : vector<2x32xf32>
    %102 = arith.mulf %92, %101 : vector<2x32xf32>
    %103 = arith.addf %24, %102 : vector<2x32xf32>
    %104 = math.tanh %103 : vector<2x32xf32>
    %cst_22 = arith.constant 1.000000e+00 : f32
    %105 = vector.broadcast %cst_22 : f32 to vector<2x32xf32>
    %106 = arith.subf %105, %99 : vector<2x32xf32>
    %107 = arith.mulf %106, %104 : vector<2x32xf32>
    %108 = arith.mulf %99, %84 : vector<2x32xf32>
    %109 = arith.addf %107, %108 : vector<2x32xf32>
    %cst_23 = arith.constant dense<0.000000e+00> : vector<2x96xf32>
    %110 = tpu.matmul %109, %30, %cst_23 {dimension_numbers = #tpu.dot_dimension_numbers<[1], [0], [0], [1], [0, 0, 1, 1], [], []>} : vector<2x32xf32>, vector<32x96xf32>, vector<2x96xf32> -> vector<2x96xf32>
    %111 = vector.extract_strided_slice %110 {offsets = [0, 0], sizes = [2, 32], strides = [1, 1]} : vector<2x96xf32> to vector<2x32xf32>
    %112 = arith.addf %9, %111 : vector<2x32xf32>
    %113 = arith.negf %112 : vector<2x32xf32>
    %114 = math.exp %113 : vector<2x32xf32>
    %cst_24 = arith.constant 1.000000e+00 : f32
    %115 = vector.broadcast %cst_24 : f32 to vector<2x32xf32>
    %116 = arith.addf %115, %114 : vector<2x32xf32>
    %117 = arith.divf %115, %116 : vector<2x32xf32>
    %118 = vector.extract_strided_slice %110 {offsets = [0, 32], sizes = [2, 32], strides = [1, 1]} : vector<2x96xf32> to vector<2x32xf32>
    %119 = arith.addf %17, %118 : vector<2x32xf32>
    %120 = arith.negf %119 : vector<2x32xf32>
    %121 = math.exp %120 : vector<2x32xf32>
    %cst_25 = arith.constant 1.000000e+00 : f32
    %122 = vector.broadcast %cst_25 : f32 to vector<2x32xf32>
    %123 = arith.addf %122, %121 : vector<2x32xf32>
    %124 = arith.divf %122, %123 : vector<2x32xf32>
    %125 = vector.extract_strided_slice %110 {offsets = [0, 64], sizes = [2, 32], strides = [1, 1]} : vector<2x96xf32> to vector<2x32xf32>
    %126 = arith.addf %125, %33 : vector<2x32xf32>
    %127 = arith.mulf %117, %126 : vector<2x32xf32>
    %128 = arith.addf %25, %127 : vector<2x32xf32>
    %129 = math.tanh %128 : vector<2x32xf32>
    %cst_26 = arith.constant 1.000000e+00 : f32
    %130 = vector.broadcast %cst_26 : f32 to vector<2x32xf32>
    %131 = arith.subf %130, %124 : vector<2x32xf32>
    %132 = arith.mulf %131, %129 : vector<2x32xf32>
    %133 = arith.mulf %124, %109 : vector<2x32xf32>
    %134 = arith.addf %132, %133 : vector<2x32xf32>
    %cst_27 = arith.constant dense<0.000000e+00> : vector<2x96xf32>
    %135 = tpu.matmul %134, %30, %cst_27 {dimension_numbers = #tpu.dot_dimension_numbers<[1], [0], [0], [1], [0, 0, 1, 1], [], []>} : vector<2x32xf32>, vector<32x96xf32>, vector<2x96xf32> -> vector<2x96xf32>
    %136 = vector.extract_strided_slice %135 {offsets = [0, 0], sizes = [2, 32], strides = [1, 1]} : vector<2x96xf32> to vector<2x32xf32>
    %137 = arith.addf %10, %136 : vector<2x32xf32>
    %138 = arith.negf %137 : vector<2x32xf32>
    %139 = math.exp %138 : vector<2x32xf32>
    %cst_28 = arith.constant 1.000000e+00 : f32
    %140 = vector.broadcast %cst_28 : f32 to vector<2x32xf32>
    %141 = arith.addf %140, %139 : vector<2x32xf32>
    %142 = arith.divf %140, %141 : vector<2x32xf32>
    %143 = vector.extract_strided_slice %135 {offsets = [0, 32], sizes = [2, 32], strides = [1, 1]} : vector<2x96xf32> to vector<2x32xf32>
    %144 = arith.addf %18, %143 : vector<2x32xf32>
    %145 = arith.negf %144 : vector<2x32xf32>
    %146 = math.exp %145 : vector<2x32xf32>
    %cst_29 = arith.constant 1.000000e+00 : f32
    %147 = vector.broadcast %cst_29 : f32 to vector<2x32xf32>
    %148 = arith.addf %147, %146 : vector<2x32xf32>
    %149 = arith.divf %147, %148 : vector<2x32xf32>
    %150 = vector.extract_strided_slice %135 {offsets = [0, 64], sizes = [2, 32], strides = [1, 1]} : vector<2x96xf32> to vector<2x32xf32>
    %151 = arith.addf %150, %33 : vector<2x32xf32>
    %152 = arith.mulf %142, %151 : vector<2x32xf32>
    %153 = arith.addf %26, %152 : vector<2x32xf32>
    %154 = math.tanh %153 : vector<2x32xf32>
    %cst_30 = arith.constant 1.000000e+00 : f32
    %155 = vector.broadcast %cst_30 : f32 to vector<2x32xf32>
    %156 = arith.subf %155, %149 : vector<2x32xf32>
    %157 = arith.mulf %156, %154 : vector<2x32xf32>
    %158 = arith.mulf %149, %134 : vector<2x32xf32>
    %159 = arith.addf %157, %158 : vector<2x32xf32>
    %cst_31 = arith.constant dense<0.000000e+00> : vector<2x96xf32>
    %160 = tpu.matmul %159, %30, %cst_31 {dimension_numbers = #tpu.dot_dimension_numbers<[1], [0], [0], [1], [0, 0, 1, 1], [], []>} : vector<2x32xf32>, vector<32x96xf32>, vector<2x96xf32> -> vector<2x96xf32>
    %161 = vector.extract_strided_slice %160 {offsets = [0, 0], sizes = [2, 32], strides = [1, 1]} : vector<2x96xf32> to vector<2x32xf32>
    %162 = arith.addf %11, %161 : vector<2x32xf32>
    %163 = arith.negf %162 : vector<2x32xf32>
    %164 = math.exp %163 : vector<2x32xf32>
    %cst_32 = arith.constant 1.000000e+00 : f32
    %165 = vector.broadcast %cst_32 : f32 to vector<2x32xf32>
    %166 = arith.addf %165, %164 : vector<2x32xf32>
    %167 = arith.divf %165, %166 : vector<2x32xf32>
    %168 = vector.extract_strided_slice %160 {offsets = [0, 32], sizes = [2, 32], strides = [1, 1]} : vector<2x96xf32> to vector<2x32xf32>
    %169 = arith.addf %19, %168 : vector<2x32xf32>
    %170 = arith.negf %169 : vector<2x32xf32>
    %171 = math.exp %170 : vector<2x32xf32>
    %cst_33 = arith.constant 1.000000e+00 : f32
    %172 = vector.broadcast %cst_33 : f32 to vector<2x32xf32>
    %173 = arith.addf %172, %171 : vector<2x32xf32>
    %174 = arith.divf %172, %173 : vector<2x32xf32>
    %175 = vector.extract_strided_slice %160 {offsets = [0, 64], sizes = [2, 32], strides = [1, 1]} : vector<2x96xf32> to vector<2x32xf32>
    %176 = arith.addf %175, %33 : vector<2x32xf32>
    %177 = arith.mulf %167, %176 : vector<2x32xf32>
    %178 = arith.addf %27, %177 : vector<2x32xf32>
    %179 = math.tanh %178 : vector<2x32xf32>
    %cst_34 = arith.constant 1.000000e+00 : f32
    %180 = vector.broadcast %cst_34 : f32 to vector<2x32xf32>
    %181 = arith.subf %180, %174 : vector<2x32xf32>
    %182 = arith.mulf %181, %179 : vector<2x32xf32>
    %183 = arith.mulf %174, %159 : vector<2x32xf32>
    %184 = arith.addf %182, %183 : vector<2x32xf32>
    %cst_35 = arith.constant dense<0.000000e+00> : vector<2x96xf32>
    %185 = tpu.matmul %184, %30, %cst_35 {dimension_numbers = #tpu.dot_dimension_numbers<[1], [0], [0], [1], [0, 0, 1, 1], [], []>} : vector<2x32xf32>, vector<32x96xf32>, vector<2x96xf32> -> vector<2x96xf32>
    %186 = vector.extract_strided_slice %185 {offsets = [0, 0], sizes = [2, 32], strides = [1, 1]} : vector<2x96xf32> to vector<2x32xf32>
    %187 = arith.addf %12, %186 : vector<2x32xf32>
    %188 = arith.negf %187 : vector<2x32xf32>
    %189 = math.exp %188 : vector<2x32xf32>
    %cst_36 = arith.constant 1.000000e+00 : f32
    %190 = vector.broadcast %cst_36 : f32 to vector<2x32xf32>
    %191 = arith.addf %190, %189 : vector<2x32xf32>
    %192 = arith.divf %190, %191 : vector<2x32xf32>
    %193 = vector.extract_strided_slice %185 {offsets = [0, 32], sizes = [2, 32], strides = [1, 1]} : vector<2x96xf32> to vector<2x32xf32>
    %194 = arith.addf %20, %193 : vector<2x32xf32>
    %195 = arith.negf %194 : vector<2x32xf32>
    %196 = math.exp %195 : vector<2x32xf32>
    %cst_37 = arith.constant 1.000000e+00 : f32
    %197 = vector.broadcast %cst_37 : f32 to vector<2x32xf32>
    %198 = arith.addf %197, %196 : vector<2x32xf32>
    %199 = arith.divf %197, %198 : vector<2x32xf32>
    %200 = vector.extract_strided_slice %185 {offsets = [0, 64], sizes = [2, 32], strides = [1, 1]} : vector<2x96xf32> to vector<2x32xf32>
    %201 = arith.addf %200, %33 : vector<2x32xf32>
    %202 = arith.mulf %192, %201 : vector<2x32xf32>
    %203 = arith.addf %28, %202 : vector<2x32xf32>
    %204 = math.tanh %203 : vector<2x32xf32>
    %cst_38 = arith.constant 1.000000e+00 : f32
    %205 = vector.broadcast %cst_38 : f32 to vector<2x32xf32>
    %206 = arith.subf %205, %199 : vector<2x32xf32>
    %207 = arith.mulf %206, %204 : vector<2x32xf32>
    %208 = arith.mulf %199, %184 : vector<2x32xf32>
    %209 = arith.addf %207, %208 : vector<2x32xf32>
    %cst_39 = arith.constant dense<0.000000e+00> : vector<2x96xf32>
    %210 = tpu.matmul %209, %30, %cst_39 {dimension_numbers = #tpu.dot_dimension_numbers<[1], [0], [0], [1], [0, 0, 1, 1], [], []>} : vector<2x32xf32>, vector<32x96xf32>, vector<2x96xf32> -> vector<2x96xf32>
    %211 = vector.extract_strided_slice %210 {offsets = [0, 0], sizes = [2, 32], strides = [1, 1]} : vector<2x96xf32> to vector<2x32xf32>
    %212 = arith.addf %13, %211 : vector<2x32xf32>
    %213 = arith.negf %212 : vector<2x32xf32>
    %214 = math.exp %213 : vector<2x32xf32>
    %cst_40 = arith.constant 1.000000e+00 : f32
    %215 = vector.broadcast %cst_40 : f32 to vector<2x32xf32>
    %216 = arith.addf %215, %214 : vector<2x32xf32>
    %217 = arith.divf %215, %216 : vector<2x32xf32>
    %218 = vector.extract_strided_slice %210 {offsets = [0, 32], sizes = [2, 32], strides = [1, 1]} : vector<2x96xf32> to vector<2x32xf32>
    %219 = arith.addf %21, %218 : vector<2x32xf32>
    %220 = arith.negf %219 : vector<2x32xf32>
    %221 = math.exp %220 : vector<2x32xf32>
    %cst_41 = arith.constant 1.000000e+00 : f32
    %222 = vector.broadcast %cst_41 : f32 to vector<2x32xf32>
    %223 = arith.addf %222, %221 : vector<2x32xf32>
    %224 = arith.divf %222, %223 : vector<2x32xf32>
    %225 = vector.extract_strided_slice %210 {offsets = [0, 64], sizes = [2, 32], strides = [1, 1]} : vector<2x96xf32> to vector<2x32xf32>
    %226 = arith.addf %225, %33 : vector<2x32xf32>
    %227 = arith.mulf %217, %226 : vector<2x32xf32>
    %228 = arith.addf %29, %227 : vector<2x32xf32>
    %229 = math.tanh %228 : vector<2x32xf32>
    %cst_42 = arith.constant 1.000000e+00 : f32
    %230 = vector.broadcast %cst_42 : f32 to vector<2x32xf32>
    %231 = arith.subf %230, %224 : vector<2x32xf32>
    %232 = arith.mulf %231, %229 : vector<2x32xf32>
    %233 = arith.mulf %224, %209 : vector<2x32xf32>
    %234 = arith.addf %232, %233 : vector<2x32xf32>
    %c0_43 = arith.constant 0 : index
    %c0_44 = arith.constant 0 : index
    %235 = vector.load %arg9[%c0_43, %c0_44] : memref<2x32xf32, #tpu.memory_space<vmem>>, vector<2x32xf32>
    tpu.vector_store %arg9[%c0_43, %c0_44], %234 {strides = array<i32>} : memref<2x32xf32, #tpu.memory_space<vmem>>, vector<2x32xf32>,
    %236 = tpu.concatenate %59, %84, %109, %134, %159, %184, %209, %234 in 0 : vector<2x32xf32>, vector<2x32xf32>, vector<2x32xf32>, vector<2x32xf32>, vector<2x32xf32>, vector<2x32xf32>, vector<2x32xf32>, vector<2x32xf32> -> vector<16x32xf32>
    %c0_45 = arith.constant 0 : index
    %c0_46 = arith.constant 0 : index
    %237 = vector.load %arg6[%c0_45, %c0_46] : memref<32x1xf32, #tpu.memory_space<vmem>>, vector<32x1xf32>
    %cst_47 = arith.constant dense<0.000000e+00> : vector<16x1xf32>
    %238 = tpu.matmul %236, %237, %cst_47 {dimension_numbers = #tpu.dot_dimension_numbers<[1], [0], [0], [1], [0, 0, 1, 1], [], []>} : vector<16x32xf32>, vector<32x1xf32>, vector<16x1xf32> -> vector<16x1xf32>
    %c0_48 = arith.constant 0 : index
    %c0_49 = arith.constant 0 : index
    %239 = vector.load %arg7[%c0_48, %c0_49] : memref<1x1xf32, #tpu.memory_space<vmem>>, vector<1x1xf32>
    %240 = vector.broadcast %239 : vector<1x1xf32> to vector<16x1xf32>
    %241 = arith.addf %238, %240 : vector<16x1xf32>
    %c0_50 = arith.constant 0 : index
    %c0_51 = arith.constant 0 : index
    %242 = vector.load %arg8[%c0_50, %c0_51] : memref<16x1xf32, #tpu.memory_space<vmem>>, vector<16x1xf32>
    tpu.vector_store %arg8[%c0_50, %c0_51], %241 {strides = array<i32>} : memref<16x1xf32, #tpu.memory_space<vmem>>, vector<16x1xf32>,
    return
  }
}

</mosaic_0001>

<bundles_post_ra>
// kernel: gru_model_forward.1
= control target key start
LH: loop header
LB: loop body
LE: loop exit
PB: predicated region body
PF: predicated region fallthrough
CT: control target
= control target key end

     0   :  { %s1684_s0 = inlined_call_operand.vmem [shape: f32[16,1], index: 0, kind: input, shape index: {}]   ;;  %s1685_s1 = inlined_call_operand.vmem [shape: f32[2,32], index: 1, kind: input, shape index: {}]   ;;  %s1686_s2 = inlined_call_operand.vmem [shape: f32[1,96], index: 2, kind: input, shape index: {}]   ;;  %s1687_s3 = inlined_call_operand.vmem [shape: f32[32,96], index: 3, kind: input, shape index: {}]   ;;  %s1688_s4 = inlined_call_operand.vmem [shape: f32[1,96], index: 4, kind: input, shape index: {}]   ;;  %s1689_s5 = inlined_call_operand.vmem [shape: f32[1,32], index: 5, kind: input, shape index: {}]   ;;  %s1690_s6 = inlined_call_operand.vmem [shape: f32[32,1], index: 6, kind: input, shape index: {}]   ;;  %s1691_s7 = inlined_call_operand.<no memory space> [shape: f32[1,1], index: 7, kind: input, shape index: {}]   ;;  %s1692_s8 = inlined_call_operand.vmem [shape: f32[16,1], index: 8, kind: output, shape index: {0}]   ;;  %s1693_s9 = inlined_call_operand.hbm [shape: f32[2,32], index: 9, kind: output, shape index: {1}]  }
   0x1   :  { %v15_v0 = vstv %s1691_s7 }
   0x2   :  { %16 = vst [vmem:[#allocation2] sm:$0x1] %v15_v0 }
   0x3   :  { %v1450_v1 = vld [vmem:[%s1687_s3 + $0x18] sm:$0xff]  ;;  %v36_v2 = vld [vmem:[%s1686_s2] sm:$0x1]  ;;  %vm51_vm0 = vcmask 1040384   ;;  %v1388_v4 = vmov 0.0   ;;  %vm44_vm1 = vcmask 7168  }
   0x4   :  { %v34_v3 = vld [vmem:[%s1684_s0] sm:$0xff]  ;;  %1213 = vmatprep.subr.mxu1 %v1388_v4  ;;  %1208 = vmatprep.subr.msk.mxu0 %vm51_vm0, %v36_v2  ;;  %v1462_v5 = vld [vmem:[%s1687_s3 + $0x10] sm:$0xff]  ;;  %v35_v6 = vld [vmem:[%s1684_s0 + $0x8] sm:$0xff] }
   0x5   :  { %1214 = vmatpush3.msra.mxu1 %v1450_v1  ;;  %1209 = vmatpush3.msk.msra.mxu0 %vm51_vm0, %v36_v2  ;;  %v1473_v7 = vld [vmem:[%s1687_s3 + $0x8] sm:$0xff]  ;;  %v1139_v8 = vld [vmem:[%s1689_s5] ss:$0 sm:$0xff] }
   0x6   :  { %1215 = vmatprep.subr.mxu1 %v1388_v4  ;;  %1210 = vmatprep.mubr.msk.f32.mxu0 %vm44_vm1, %v34_v3 }
   0x7   :  { %17 = vsyncpa [#allocation4], 0  ;;  %1216 = vmatpush3.msra.mxu1 %v1462_v5  ;;  %1211 = vmatmul.mubr.msk.f32.vlgmr.msra.gmra.mxu0 %vm44_vm1, %v35_v6  ;;  %v1484_v9 = vld [vmem:[%s1687_s3] sm:$0xff]  ;;  %vm1389_vm2 = vmmov 0   ;;  %vm141_vm3 = vcmask 261120   ;;  %s1390_s25 = smov 64  }
   0x8   :  { %1217 = vmatprep.subr.mxu1 %v1388_v4  ;;  %1221 = vmatprep.mubr.msk.f32.mxu1 %vm1389_vm2, %v1388_v4  ;;  %v140_v10 = vld [vmem:[%s1685_s1] sm:$0x3]  ;;  %s1391_s26 = smov 32   ;;  %vm1010_vm4 = vcmask 1041408   ;;  %vm1012_vm5 = vcmask 1043456   ;;  %vm1014_vm6 = vcmask 1045504  }
   0x9   :  { %1218 = vmatpush3.msra.mxu1 %v1473_v7  ;;  %222 = vrot.lane.b32.xlu0 %v1139_v8, %s1390_s25  ;;  %v1135_v12 = vld [vmem:[%s1688_s4] ss:$0 sm:$0xff]  ;;  %s1392_s4 = smov 96   ;;  %vm1008_vm7 = vcmask 261126  }
   0xa   :  { %1219 = vmatprep.subr.mxu1 %v1388_v4  ;;  %1224 = vmatprep.subr.mxu0 %v1388_v4 }
   0xb   :  { %1220 = vmatpush3.msra.mxu1 %v1484_v9  ;;  %1225 = vmatpush3.msra.mxu0 %v1450_v1 }
   0xc   :  { %1222 = vmatmul.mubr.msk.f32.vlgmr.msra.gmra.mxu1 %vm141_vm3, %v140_v10  ;;  %1226 = vmatprep.subr.mxu0 %v1388_v4 }
   0xd   :  { %1227 = vmatpush3.msra.mxu0 %v1462_v5  ;;  %1232 = vmatprep.mubr.msk.f32.mxu0 %vm1389_vm2, %v1388_v4 }
   0xe   :  { %1228 = vmatprep.subr.mxu0 %v1388_v4  ;;  %1235 = vmatprep.subr.mxu1 %v1388_v4 }
   0xf   :  { %1229 = vmatpush3.msra.mxu0 %v1473_v7  ;;  %1236 = vmatpush3.msra.mxu1 %v1450_v1 }
  0x10   :  { %1230 = vmatprep.subr.mxu0 %v1388_v4  ;;  %1237 = vmatprep.subr.mxu1 %v1388_v4 }
  0x11   :  { %1231 = vmatpush3.msra.mxu0 %v1484_v9  ;;  %1238 = vmatpush3.msra.mxu1 %v1462_v5 }
  0x12   :  { %1239 = vmatprep.subr.mxu1 %v1388_v4  ;;  %1243 = vmatprep.mubr.msk.f32.mxu1 %vm1389_vm2, %v1388_v4 }
  0x13   :  { %1240 = vmatpush3.msra.mxu1 %v1473_v7  ;;  %1246 = vmatprep.subr.mxu0 %v1388_v4 }
  0x14   :  { %1241 = vmatprep.subr.mxu1 %v1388_v4 }
  0x15   :  { %1242 = vmatpush3.msra.mxu1 %v1484_v9 }
  0x16   :  { %1257 = vmatprep.subr.mxu1 %v1388_v4 }
  0x7b   :  { %v1523_v14 = vpop.permute.xlu0 %222 }
  0xc7   :  { %v1212_v11 = vpop.f32.mrf.mxu0 }
  0xc8   :  { %v1521_v13 = vadd.f32 %v1212_v11, %v1135_v12 }
  0xc9   :  { %v121_v18 = vpop.f32.mrf.mxu0 }
  0xca   :  { %v1527_v19 = vadd.f32 %v1135_v12, %v121_v18 }
  0xcc   :  { %v211_v15 = vpop.f32.mrf.mxu1 }
  0xcd   :  { %v225_v16 = vadd.f32 %v1523_v14, %v211_v15  ;;  %v215_v20 = vadd.f32 %v211_v15, %v1527_v19 }
  0xce   :  { %v1223_v17 = vpop.f32.mrf.mxu1 }
  0xcf   :  { %227 = vrot.lane.b32.xlu0 %v225_v16, %s1390_s25  ;;  %v1141_v21 = vmul.f32 -1.442695, %v215_v20 }
  0xd1   :  { %1318 = vpow2.f32 %v1141_v21 }
  0xd3   :  { %243 = vrot.lane.b32.xlu0 %v140_v10, %s1391_s26 }
  0xde   :  { %v1319_v22 = vpop.eup %1318 }
  0xdf   :  { %v219_v23 = vadd.f32 1.0, %v1319_v22 }
  0xe1   :  { %1320 = vrcp.f32 %v219_v23 }
  0xee   :  { %v1321_v24 = vpop.eup %1320 }
  0xef   :  { %v237_v31 = vsub.f32 1.0, %v1321_v24 }
 0x141   :  { %v228_v25 = vpop.permute.xlu0 %227 }
 0x142   :  { %v230_v26 = vmul.f32 %v1321_v24, %v228_v25 }
 0x144   :  { %232 = vrot.lane.b32.xlu1 %v230_v26, %s1390_s25 }
 0x145   :  { %v244_v30 = vpop.permute.xlu0 %243 }
 0x146   :  { %v246_v33 = vmul.f32 %v1321_v24, %v244_v30 }
 0x1b6   :  { %v233_v27 = vpop.permute.xlu1 %232 }
 0x1b7   :  { %v235_v28 = vadd.f32 %v233_v27, %v1527_v19 }
 0x1b9   :  { %1322 = vtanh.f32 %v235_v28 }
 0x1c6   :  { %v1323_v29 = vpop.eup %1322 }
 0x1c7   :  { %239 = vrot.lane.b32.xlu1 %v1323_v29, %s1392_s4 }
 0x239   :  { %v240_v32 = vpop.permute.xlu1 %239 }
 0x23a   :  { %v242_v34 = vmul.f32 %v240_v32, %v237_v31 }
 0x23c   :  { %v1533_v35 = vadd.f32 %v246_v33, %v242_v34 }
 0x23e   :  { %249 = vrot.lane.b32.xlu1 %v1533_v35, %s1392_s4  ;;  %v352_v53 = vrot.slane %v1533_v35, 6 }
 0x2b0   :  { %v250_v36 = vpop.permute.xlu1 %249 }
 0x2b1   :  { %1233 = vmatmul.mubr.msk.f32.vlgmr.msra.gmra.mxu0 %vm141_vm3, %v250_v36 }
 0x2b2   :  { %1247 = vmatpush3.msra.mxu0 %v1450_v1  ;;  %1254 = vmatprep.mubr.msk.f32.mxu0 %vm1389_vm2, %v1388_v4 }
 0x2b3   :  { %1248 = vmatprep.subr.mxu0 %v1388_v4 }
 0x2b4   :  { %1249 = vmatpush3.msra.mxu0 %v1462_v5 }
 0x2b5   :  { %1250 = vmatprep.subr.mxu0 %v1388_v4 }
 0x2b6   :  { %1251 = vmatpush3.msra.mxu0 %v1473_v7 }
 0x2b7   :  { %1252 = vmatprep.subr.mxu0 %v1388_v4 }
 0x2b8   :  { %1253 = vmatpush3.msra.mxu0 %v1484_v9 }
 0x2b9   :  { %1268 = vmatprep.subr.mxu0 %v1388_v4 }
 0x371   :  { %v319_v37 = vpop.f32.mrf.mxu0 }
 0x372   :  { %v333_v38 = vadd.f32 %v319_v37, %v1523_v14  ;;  %v324_v41 = vrot.slane %v319_v37, 6 }
 0x373   :  { %v1234_v39 = vpop.f32.mrf.mxu0 }
 0x374   :  { %v335_v40 = vrot.slane %v333_v38, 6  ;;  %v326_v42 = vadd.f32 %v324_v41, %v1527_v19 }
 0x376   :  { %336 = vrot.lane.b32.xlu0 %v335_v40, %s1390_s25  ;;  %v1143_v43 = vmul.f32 -1.442695, %v326_v42 }
 0x378   :  { %1324 = vpow2.f32 %v1143_v43 }
 0x385   :  { %v1325_v44 = vpop.eup %1324 }
 0x386   :  { %v330_v45 = vadd.f32 1.0, %v1325_v44 }
 0x388   :  { %1326 = vrcp.f32 %v330_v45 }
 0x395   :  { %v1327_v46 = vpop.eup %1326 }
 0x396   :  { %v346_v52 = vsub.f32 1.0, %v1327_v46  ;;  %v354_v56 = vmul.f32 %v1327_v46, %v352_v53 }
 0x3e8   :  { %v337_v47 = vpop.permute.xlu0 %336 }
 0x3e9   :  { %v339_v48 = vmul.f32 %v1327_v46, %v337_v47 }
 0x3eb   :  { %341 = vrot.lane.b32.xlu1 %v339_v48, %s1390_s25 }
 0x45d   :  { %v342_v49 = vpop.permute.xlu1 %341 }
 0x45e   :  { %v344_v50 = vadd.f32 %v342_v49, %v1527_v19 }
 0x460   :  { %1328 = vtanh.f32 %v344_v50 }
 0x46d   :  { %v1329_v51 = vpop.eup %1328 }
 0x46e   :  { %348 = vrot.lane.b32.xlu0 %v1329_v51, %s1392_s4 }
 0x4e0   :  { %v349_v54 = vpop.permute.xlu0 %348 }
 0x4e1   :  { %v351_v55 = vmul.f32 %v349_v54, %v346_v52 }
 0x4e3   :  { %v355_v57 = vadd.f32 %v354_v56, %v351_v55 }
 0x4e5   :  { %v357_v58 = vrot.slane %v355_v57, 2  ;;  %v461_v20 = vrot.slane %v355_v57, 6  ;;  %v1011_v25 = vsel %vm1010_vm4, %v1533_v35, %v355_v57 }
 0x4e7   :  { %358 = vrot.lane.b32.xlu1 %v357_v58, %s1392_s4 }
 0x559   :  { %v359_v59 = vpop.permute.xlu1 %358 }
 0x55a   :  { %1244 = vmatmul.mubr.msk.f32.vlgmr.msra.gmra.mxu1 %vm141_vm3, %v359_v59 }
 0x55b   :  { %1258 = vmatpush3.msra.mxu1 %v1450_v1  ;;  %1265 = vmatprep.mubr.msk.f32.mxu1 %vm1389_vm2, %v1388_v4 }
 0x55c   :  { %1259 = vmatprep.subr.mxu1 %v1388_v4 }
 0x55d   :  { %1260 = vmatpush3.msra.mxu1 %v1462_v5 }
 0x55e   :  { %1261 = vmatprep.subr.mxu1 %v1388_v4 }
 0x55f   :  { %1262 = vmatpush3.msra.mxu1 %v1473_v7 }
 0x560   :  { %1263 = vmatprep.subr.mxu1 %v1388_v4 }
 0x561   :  { %1264 = vmatpush3.msra.mxu1 %v1484_v9 }
 0x562   :  { %1279 = vmatprep.subr.mxu1 %v1388_v4 }
 0x61a   :  { %v428_v60 = vpop.f32.mrf.mxu1 }
 0x61b   :  { %v442_v61 = vadd.f32 %v428_v60, %v1523_v14  ;;  %v433_v0 = vrot.slane %v428_v60, 4 }
 0x61c   :  { %v1245_v62 = vpop.f32.mrf.mxu1 }
 0x61d   :  { %v444_v63 = vrot.slane %v442_v61, 4  ;;  %v435_v2 = vadd.f32 %v433_v0, %v1527_v19 }
 0x61f   :  { %445 = vrot.lane.b32.xlu0 %v444_v63, %s1390_s25  ;;  %v1145_v3 = vmul.f32 -1.442695, %v435_v2 }
 0x621   :  { %1330 = vpow2.f32 %v1145_v3 }
 0x62e   :  { %v1331_v6 = vpop.eup %1330 }
 0x62f   :  { %v439_v8 = vadd.f32 1.0, %v1331_v6 }
 0x631   :  { %1332 = vrcp.f32 %v439_v8 }
 0x63e   :  { %v1333_v10 = vpop.eup %1332 }
 0x63f   :  { %v455_v18 = vsub.f32 1.0, %v1333_v10  ;;  %v463_v22 = vmul.f32 %v1333_v10, %v461_v20 }
 0x691   :  { %v446_v11 = vpop.permute.xlu0 %445 }
 0x692   :  { %v448_v12 = vmul.f32 %v1333_v10, %v446_v11 }
 0x694   :  { %450 = vrot.lane.b32.xlu1 %v448_v12, %s1390_s25 }
 0x706   :  { %v451_v15 = vpop.permute.xlu1 %450 }
 0x707   :  { %v453_v16 = vadd.f32 %v451_v15, %v1527_v19 }
 0x709   :  { %1334 = vtanh.f32 %v453_v16 }
 0x716   :  { %v1335_v17 = vpop.eup %1334 }
 0x717   :  { %457 = vrot.lane.b32.xlu0 %v1335_v17, %s1392_s4 }
 0x789   :  { %v458_v21 = vpop.permute.xlu0 %457 }
 0x78a   :  { %v460_v23 = vmul.f32 %v458_v21, %v455_v18 }
 0x78c   :  { %v464_v24 = vadd.f32 %v463_v22, %v460_v23 }
 0x78e   :  { %v466_v26 = vrot.slane %v464_v24, 4  ;;  %v1013_v27 = vsel %vm1012_vm5, %v1011_v25, %v464_v24  ;;  %v570_v45 = vrot.slane %v464_v24, 6 }
 0x790   :  { %467 = vrot.lane.b32.xlu1 %v466_v26, %s1392_s4 }
 0x802   :  { %v468_v28 = vpop.permute.xlu1 %467 }
 0x803   :  { %1255 = vmatmul.mubr.msk.f32.vlgmr.msra.gmra.mxu0 %vm141_vm3, %v468_v28 }
 0x804   :  { %1269 = vmatpush3.msra.mxu0 %v1450_v1  ;;  %1276 = vmatprep.mubr.msk.f32.mxu0 %vm1389_vm2, %v1388_v4 }
 0x805   :  { %1270 = vmatprep.subr.mxu0 %v1388_v4 }
 0x806   :  { %1271 = vmatpush3.msra.mxu0 %v1462_v5 }
 0x807   :  { %1272 = vmatprep.subr.mxu0 %v1388_v4 }
 0x808   :  { %1273 = vmatpush3.msra.mxu0 %v1473_v7 }
 0x809   :  { %1274 = vmatprep.subr.mxu0 %v1388_v4 }
 0x80a   :  { %1275 = vmatpush3.msra.mxu0 %v1484_v9 }
 0x80b   :  { %1290 = vmatprep.subr.mxu0 %v1388_v4 }
 0x8c3   :  { %v537_v29 = vpop.f32.mrf.mxu0 }
 0x8c4   :  { %v551_v30 = vadd.f32 %v537_v29, %v1523_v14  ;;  %v542_v33 = vrot.slane %v537_v29, 2 }
 0x8c5   :  { %v1256_v31 = vpop.f32.mrf.mxu0 }
 0x8c6   :  { %v553_v32 = vrot.slane %v551_v30, 2  ;;  %v544_v34 = vadd.f32 %v542_v33, %v1527_v19 }
 0x8c8   :  { %554 = vrot.lane.b32.xlu0 %v553_v32, %s1390_s25  ;;  %v1147_v35 = vmul.f32 -1.442695, %v544_v34 }
 0x8ca   :  { %1336 = vpow2.f32 %v1147_v35 }
 0x8d7   :  { %v1337_v36 = vpop.eup %1336 }
 0x8d8   :  { %v548_v37 = vadd.f32 1.0, %v1337_v36 }
 0x8da   :  { %1338 = vrcp.f32 %v548_v37 }
 0x8e7   :  { %v1339_v38 = vpop.eup %1338 }
 0x8e8   :  { %v564_v44 = vsub.f32 1.0, %v1339_v38  ;;  %v572_v47 = vmul.f32 %v1339_v38, %v570_v45 }
 0x93a   :  { %v555_v39 = vpop.permute.xlu0 %554 }
 0x93b   :  { %v557_v40 = vmul.f32 %v1339_v38, %v555_v39 }
 0x93d   :  { %559 = vrot.lane.b32.xlu1 %v557_v40, %s1390_s25 }
 0x9af   :  { %v560_v41 = vpop.permute.xlu1 %559 }
 0x9b0   :  { %v562_v42 = vadd.f32 %v560_v41, %v1527_v19 }
 0x9b2   :  { %1340 = vtanh.f32 %v562_v42 }
 0x9bf   :  { %v1341_v43 = vpop.eup %1340 }
 0x9c0   :  { %566 = vrot.lane.b32.xlu0 %v1341_v43, %s1392_s4 }
 0xa32   :  { %v567_v46 = vpop.permute.xlu0 %566 }
 0xa33   :  { %v569_v48 = vmul.f32 %v567_v46, %v564_v44 }
 0xa35   :  { %v573_v49 = vadd.f32 %v572_v47, %v569_v48 }
 0xa37   :  { %v575_v50 = vrot.slane %v573_v49, 6  ;;  %v1595_v51 = vsel %vm1014_vm6, %v1013_v27, %v573_v49 }
 0xa39   :  { %576 = vrot.lane.b32.xlu1 %v575_v50, %s1392_s4 }
 0xaab   :  { %v577_v52 = vpop.permute.xlu1 %576 }
 0xaac   :  { %1266 = vmatmul.mubr.msk.f32.vlgmr.msra.gmra.mxu1 %vm141_vm3, %v577_v52 }
 0xaad   :  { %1280 = vmatpush3.msra.mxu1 %v1450_v1  ;;  %1287 = vmatprep.mubr.msk.f32.mxu1 %vm1389_vm2, %v1388_v4 }
 0xaae   :  { %1281 = vmatprep.subr.mxu1 %v1388_v4 }
 0xaaf   :  { %1282 = vmatpush3.msra.mxu1 %v1462_v5 }
 0xab0   :  { %1283 = vmatprep.subr.mxu1 %v1388_v4 }
 0xab1   :  { %1284 = vmatpush3.msra.mxu1 %v1473_v7 }
 0xab2   :  { %1285 = vmatprep.subr.mxu1 %v1388_v4 }
 0xab3   :  { %1286 = vmatpush3.msra.mxu1 %v1484_v9 }
 0xb6c   :  { %v646_v19 = vpop.f32.mrf.mxu1 }
 0xb6d   :  { %v657_v53 = vadd.f32 %v646_v19, %v1523_v14  ;;  %v650_v55 = vadd.f32 %v646_v19, %v1521_v13 }
 0xb6e   :  { %v1267_v54 = vpop.f32.mrf.mxu1 }
 0xb6f   :  { %659 = vrot.lane.b32.xlu0 %v657_v53, %s1390_s25  ;;  %v1149_v56 = vmul.f32 -1.442695, %v650_v55 }
 0xb71   :  { %1342 = vpow2.f32 %v1149_v56 }
 0xb7e   :  { %v1343_v57 = vpop.eup %1342 }
 0xb7f   :  { %v654_v58 = vadd.f32 1.0, %v1343_v57 }
 0xb81   :  { %1344 = vrcp.f32 %v654_v58 }
 0xb8e   :  { %v1345_v59 = vpop.eup %1344 }
 0xb8f   :  { %v669_v2 = vsub.f32 1.0, %v1345_v59  ;;  %v676_v6 = vmul.f32 %v1345_v59, %v575_v50 }
 0xbe1   :  { %v660_v60 = vpop.permute.xlu0 %659 }
 0xbe2   :  { %v662_v61 = vmul.f32 %v1345_v59, %v660_v60 }
 0xbe4   :  { %664 = vrot.lane.b32.xlu1 %v662_v61, %s1390_s25 }
 0xc56   :  { %v665_v62 = vpop.permute.xlu1 %664 }
 0xc57   :  { %v667_v63 = vadd.f32 %v665_v62, %v1521_v13 }
 0xc59   :  { %1346 = vtanh.f32 %v667_v63 }
 0xc66   :  { %v1347_v0 = vpop.eup %1346 }
 0xc67   :  { %671 = vrot.lane.b32.xlu0 %v1347_v0, %s1392_s4 }
 0xcd9   :  { %v672_v3 = vpop.permute.xlu0 %671 }
 0xcda   :  { %v674_v8 = vmul.f32 %v672_v3, %v669_v2 }
 0xcdc   :  { %v1614_v10 = vadd.f32 %v676_v6, %v674_v8 }
 0xcde   :  { %679 = vrot.lane.b32.xlu1 %v1614_v10, %s1392_s4  ;;  %v782_v26 = vrot.slane %v1614_v10, 6 }
 0xd50   :  { %v680_v11 = vpop.permute.xlu1 %679 }
 0xd51   :  { %1277 = vmatmul.mubr.msk.f32.vlgmr.msra.gmra.mxu0 %vm141_vm3, %v680_v11 }
 0xd52   :  { %1291 = vmatpush3.msra.mxu0 %v1450_v1  ;;  %1298 = vmatprep.mubr.msk.f32.mxu0 %vm1389_vm2, %v1388_v4 }
 0xd53   :  { %1292 = vmatprep.subr.mxu0 %v1388_v4 }
 0xd54   :  { %1293 = vmatpush3.msra.mxu0 %v1462_v5 }
 0xd55   :  { %1294 = vmatprep.subr.mxu0 %v1388_v4 }
 0xd56   :  { %1295 = vmatpush3.msra.mxu0 %v1473_v7 }
 0xd57   :  { %1296 = vmatprep.subr.mxu0 %v1388_v4 }
 0xd58   :  { %1297 = vmatpush3.msra.mxu0 %v1484_v9 }
 0xe11   :  { %v749_v12 = vpop.f32.mrf.mxu0 }
 0xe12   :  { %v763_v15 = vadd.f32 %v749_v12, %v1523_v14  ;;  %v754_v17 = vrot.slane %v749_v12, 6 }
 0xe13   :  { %v1278_v16 = vpop.f32.mrf.mxu0 }
 0xe14   :  { %v765_v1 = vrot.slane %v763_v15, 6  ;;  %v756_v18 = vadd.f32 %v754_v17, %v1521_v13  ;;  %v1022_v15 = vld [vmem:[%s1690_s6 + $0x18] sm:$0xff]  ;;  %v1021_v16 = vld [vmem:[%s1690_s6 + $0x10] sm:$0xff] }
 0xe15   :  { %1301 = vmatprep.subr.mxu1 %v1022_v15 }
 0xe16   :  { %766 = vrot.lane.b32.xlu0 %v765_v1, %s1390_s25  ;;  %v1151_v20 = vmul.f32 -1.442695, %v756_v18 }
 0xe18   :  { %1348 = vpow2.f32 %v1151_v20 }
 0xe25   :  { %v1349_v5 = vpop.eup %1348 }
 0xe26   :  { %v760_v21 = vadd.f32 1.0, %v1349_v5 }
 0xe28   :  { %1350 = vrcp.f32 %v760_v21 }
 0xe35   :  { %v1351_v7 = vpop.eup %1350 }
 0xe36   :  { %v776_v25 = vsub.f32 1.0, %v1351_v7  ;;  %v784_v29 = vmul.f32 %v1351_v7, %v782_v26 }
 0xe88   :  { %v767_v22 = vpop.permute.xlu0 %766 }
 0xe89   :  { %v769_v4 = vmul.f32 %v1351_v7, %v767_v22 }
 0xe8b   :  { %771 = vrot.lane.b32.xlu1 %v769_v4, %s1390_s25 }
 0xefd   :  { %v772_v9 = vpop.permute.xlu1 %771 }
 0xefe   :  { %v774_v23 = vadd.f32 %v772_v9, %v1521_v13 }
 0xf00   :  { %1352 = vtanh.f32 %v774_v23 }
 0xf0d   :  { %v1353_v24 = vpop.eup %1352 }
 0xf0e   :  { %778 = vrot.lane.b32.xlu0 %v1353_v24, %s1392_s4 }
 0xf80   :  { %v779_v27 = vpop.permute.xlu0 %778 }
 0xf81   :  { %v781_v28 = vmul.f32 %v779_v27, %v776_v25 }
 0xf83   :  { %v785_v30 = vadd.f32 %v784_v29, %v781_v28 }
 0xf85   :  { %v787_v31 = vrot.slane %v785_v30, 2  ;;  %v891_v49 = vrot.slane %v785_v30, 6  ;;  %v1016_v54 = vsel %vm1010_vm4, %v1614_v10, %v785_v30 }
 0xf87   :  { %788 = vrot.lane.b32.xlu1 %v787_v31, %s1392_s4 }
 0xff9   :  { %v789_v32 = vpop.permute.xlu1 %788 }
 0xffa   :  { %1288 = vmatmul.mubr.msk.f32.vlgmr.msra.gmra.mxu1 %vm141_vm3, %v789_v32 }
 0xffb   :  { %1302 = vmatpush3.msra.mxu1 %v1022_v15 }
 0xffc   :  { %1303 = vmatprep.subr.mxu1 %v1021_v16 }
 0xffd   :  { %1304 = vmatpush3.msra.mxu1 %v1021_v16 }
0x10ba   :  { %v858_v33 = vpop.f32.mrf.mxu1 }
0x10bb   :  { %v872_v34 = vadd.f32 %v858_v33, %v1523_v14  ;;  %v863_v37 = vrot.slane %v858_v33, 4 }
0x10bc   :  { %v1289_v35 = vpop.f32.mrf.mxu1 }
0x10bd   :  { %v874_v36 = vrot.slane %v872_v34, 4  ;;  %v865_v38 = vadd.f32 %v863_v37, %v1521_v13 }
0x10bf   :  { %875 = vrot.lane.b32.xlu0 %v874_v36, %s1390_s25  ;;  %v1153_v39 = vmul.f32 -1.442695, %v865_v38 }
0x10c1   :  { %1354 = vpow2.f32 %v1153_v39 }
0x10ce   :  { %v1355_v40 = vpop.eup %1354 }
0x10cf   :  { %v869_v41 = vadd.f32 1.0, %v1355_v40 }
0x10d1   :  { %1356 = vrcp.f32 %v869_v41 }
0x10de   :  { %v1357_v42 = vpop.eup %1356 }
0x10df   :  { %v885_v48 = vsub.f32 1.0, %v1357_v42  ;;  %v893_v52 = vmul.f32 %v1357_v42, %v891_v49 }
0x1131   :  { %v876_v43 = vpop.permute.xlu0 %875 }
0x1132   :  { %v878_v44 = vmul.f32 %v1357_v42, %v876_v43 }
0x1134   :  { %880 = vrot.lane.b32.xlu1 %v878_v44, %s1390_s25 }
0x11a6   :  { %v881_v45 = vpop.permute.xlu1 %880 }
0x11a7   :  { %v883_v46 = vadd.f32 %v881_v45, %v1521_v13 }
0x11a9   :  { %1358 = vtanh.f32 %v883_v46 }
0x11b6   :  { %v1359_v47 = vpop.eup %1358 }
0x11b7   :  { %887 = vrot.lane.b32.xlu0 %v1359_v47, %s1392_s4 }
0x1229   :  { %v888_v50 = vpop.permute.xlu0 %887 }
0x122a   :  { %v890_v19 = vmul.f32 %v888_v50, %v885_v48 }
0x122c   :  { %v894_v53 = vadd.f32 %v893_v52, %v890_v19 }
0x122e   :  { %v896_v55 = vrot.slane %v894_v53, 4  ;;  %v1017_v56 = vsel %vm1012_vm5, %v1016_v54, %v894_v53  ;;  %v1000_v18 = vrot.slane %v894_v53, 6 }
0x1230   :  { %897 = vrot.lane.b32.xlu1 %v896_v55, %s1392_s4 }
0x12a2   :  { %v898_v57 = vpop.permute.xlu1 %897 }
0x12a3   :  { %1299 = vmatmul.mubr.msk.f32.vlgmr.msra.gmra.mxu0 %vm141_vm3, %v898_v57 }
0x1363   :  { %v967_v58 = vpop.f32.mrf.mxu0 }
0x1364   :  { %v981_v59 = vadd.f32 %v967_v58, %v1523_v14  ;;  %v972_v62 = vrot.slane %v967_v58, 2 }
0x1365   :  { %v1300_v60 = vpop.f32.mrf.mxu0 }
0x1366   :  { %v983_v61 = vrot.slane %v981_v59, 2  ;;  %v974_v63 = vadd.f32 %v972_v62, %v1521_v13 }
0x1368   :  { %984 = vrot.lane.b32.xlu0 %v983_v61, %s1390_s25  ;;  %v1155_v0 = vmul.f32 -1.442695, %v974_v63 }
0x136a   :  { %1360 = vpow2.f32 %v1155_v0 }
0x1377   :  { %v1361_v2 = vpop.eup %1360 }
0x1378   :  { %v978_v3 = vadd.f32 1.0, %v1361_v2 }
0x137a   :  { %1362 = vrcp.f32 %v978_v3 }
0x1387   :  { %v1363_v6 = vpop.eup %1362 }
0x1388   :  { %v994_v17 = vsub.f32 1.0, %v1363_v6  ;;  %v1002_v5 = vmul.f32 %v1363_v6, %v1000_v18 }
0x13da   :  { %v985_v8 = vpop.permute.xlu0 %984 }
0x13db   :  { %v987_v10 = vmul.f32 %v1363_v6, %v985_v8 }
0x13dd   :  { %989 = vrot.lane.b32.xlu1 %v987_v10, %s1390_s25 }
0x13e1   :  { %1032 = vrot.lane.b32.xlu1 %v1595_v51, %s1392_s4  ;;  %v1020_v51 = vld [vmem:[%s1690_s6 + $0x8] sm:$0xff] }
0x13e2   :  { %1305 = vmatprep.subr.mxu1 %v1020_v51 }
0x13e3   :  { %1306 = vmatpush3.msra.mxu1 %v1020_v51 }
0x144f   :  { %v990_v14 = vpop.permute.xlu1 %989 }
0x1450   :  { %v992_v11 = vadd.f32 %v990_v14, %v1521_v13  ;;  %v1019_v13 = vld [vmem:[%s1690_s6] sm:$0xff]  ;;  %s1393_s6 = smov [#allocation3]  }
0x1451   :  { %1307 = vmatprep.subr.mxu1 %v1019_v13  ;;  %s1125_s14 = sshll.u32 %s1393_s6, 4  ;;  %s1126_s14 = int_to_ptr.vmem [resolvable:$true] %s1125_s14 }
0x1452   :  { %1364 = vtanh.f32 %v992_v11  ;;  %1308 = vmatpush3.msra.mxu1 %v1019_v13  ;;  %s1366_s15 = scalar_lea.vmem %s1126_s14, 32  ;;  %p1371_p1 = scmp.lt.s32.totalorder %s1126_s14, %s1126_s14 }
0x1453   :  { %v1033_v12 = vpop.permute.xlu1 %1032  ;;  %p1367_p0 = scmp.ne.s32.totalorder %s1126_s14, %s1366_s15  ;;  %p1372_p2 = scmp.lt.s32.totalorder %s1366_s15, %s1366_s15 }
0x1454   :  { %1309 = vmatprep.mubr.msk.f32.mxu1 %vm141_vm3, %v1033_v12 }
0x1455   :  { %p1373_p3 = por %p1372_p2, %p1371_p1 }
0x1457   :  { %p1374_p4 = pnand %p1373_p3, %p1367_p0 }
0x145f   :  { %v1365_v1 = vpop.eup %1364 }
0x1460   :  { %996 = vrot.lane.b32.xlu0 %v1365_v1, %s1392_s4 }
0x14d2   :  { %v997_v20 = vpop.permute.xlu0 %996 }
0x14d3   :  { %v999_v21 = vmul.f32 %v997_v20, %v994_v17 }
0x14d5   :  { %v1003_v7 = vadd.f32 %v1002_v5, %v999_v21 }
0x14d7   :  { %1005 = vrot.lane.b32.xlu1 %v1003_v7, %s1392_s4  ;;  %v1018_v22 = vsel %vm1014_vm6, %v1017_v56, %v1003_v7 }
0x14d8   :  { %1034 = vrot.lane.b32.xlu0 %v1018_v22, %s1392_s4 }
0x1549   :  { %v1006_v4 = vpop.permute.xlu1 %1005 }
0x154a   :  { %1009 = vst.msk [vmem:[#allocation3 - $0x6] sm:$0xc0] %vm1008_vm7, %v1006_v4  ;;  %v1035_v9 = vpop.permute.xlu0 %1034 }
0x154b   :  { %1310 = vmatmul.mubr.msk.f32.vlgmr.msra.gmra.mxu1 %vm141_vm3, %v1035_v9 }
0x154c   :  { %1377 = shalt.err (!%p1374_p4)
}
0x154d   :  { %1128 = dma.vmem_to_hbm [thread:$0]  %s1126_s14, 32, %s1693_s9, [#allocation4]   ;;  %v1156_v23 = vld [vmem:[#allocation2] ss:$0 sm:$0xff] }
0x160b   :  { %v1311_v24 = vpop.f32.mrf.mxu1 }
0x160c   :  { %v1112_v25 = vadd.f32 %v1311_v24, %v1156_v23 }
0x160d   :  { %v1106_v26 = vpop.f32.mrf.mxu1 }
0x160e   :  { %1116 = vst.msk [vmem:[%s1692_s8 + $0x8] sm:$0xff] %vm44_vm1, %v1112_v25  ;;  %v1107_v27 = vadd.f32 %v1156_v23, %v1106_v26 }
0x1610   :  { %1115 = vst.msk [vmem:[%s1692_s8] sm:$0xff] %vm44_vm1, %v1107_v27 }
0x1611   :  { %1386 = dma.done.wait [#allocation4], 32  }
0x1612   :  { %1387 = vsyncadd [#allocation4], 4294967264 }
0x1613   :  { %1134 = vsyncpa [#allocation4], 1 }

</bundles_post_ra>
